<compile_context>
chip_gen: v6e
topology: v6e:2x2x1
jax: 0.10.0
libtpu: 0.0.40
codegen_flags: <defaults>
</compile_context>

<pallas_src>
import jax
import jax.numpy as jnp
from jax.experimental import pallas as pl
from jax.experimental.pallas import tpu as pltpu

_SQRT_2_OVER_PI = 0.7978845608028654


def _gelu_kernel(x_ref, o_ref):
    # f32 internal compute on every dtype (PyTorch-style opmath; free under DMA).
    x = x_ref[...].astype(jnp.float32)
    # 0.5 * x * (1 + tanh(sqrt(2/pi) * x * (1 + 0.044715 * x^2)))  (VALU-trimmed)
    inner = _SQRT_2_OVER_PI * x * (1.0 + 0.044715 * x * x)
    o_ref[...] = (0.5 * x * (1.0 + jnp.tanh(inner))).astype(o_ref.dtype)


def _gelu_jnp(x):
    xf = x.astype(jnp.float32)
    y = 0.5 * xf * (1.0 + jnp.tanh(_SQRT_2_OVER_PI * xf * (1.0 + 0.044715 * xf * xf)))
    return y.astype(x.dtype)


def _ceil_div(a, b):
    return -(-a // b)


def _choose_rows_per_block(rows, lanes, itemsize, sublane, target_block_bytes):
    """Byte-budgeted rows per block, rounded to the sublane pack, with an
    even grid-step count when possible (v7x two-TensorCore load balance)."""
    rpb = max(sublane, (target_block_bytes // (lanes * itemsize)) // sublane * sublane)
    steps = _ceil_div(rows, rpb)
    if steps == 1:
        if rows >= 2 * sublane:
            # Split into 2 steps so both v7x TensorCores get work.
            rpb = _ceil_div(_ceil_div(rows, 2), sublane) * sublane
        else:
            rpb = rows  # full-extent rows dim: always a legal block
    elif steps % 2 == 1:
        cand = _ceil_div(_ceil_div(rows, steps + 1), sublane) * sublane
        if cand >= sublane and _ceil_div(rows, cand) % 2 == 0:
            rpb = cand
    return rpb


def _gelu_pallas_2d(x2, rows, lanes, dtype, target_block_bytes, donate_input):
    itemsize = jnp.dtype(dtype).itemsize
    sublane = max(8, 32 // itemsize)  # 8 for f32, 16 for bf16
    rows_per_block = _choose_rows_per_block(
        rows, lanes, itemsize, sublane, target_block_bytes
    )
    grid = (pl.cdiv(rows, rows_per_block),)

    kwargs = {}
    if donate_input:
        # Output reuses the input buffer (effective only if the caller donates x).
        kwargs["input_output_aliases"] = {0: 0}

    return pl.pallas_call(
        _gelu_kernel,
        out_shape=jax.ShapeDtypeStruct((rows, lanes), dtype),
        grid_spec=pltpu.PrefetchScalarGridSpec(
            num_scalar_prefetch=0,
            grid=grid,
            in_specs=[pl.BlockSpec((rows_per_block, lanes), lambda i: (i, 0))],
            out_specs=pl.BlockSpec((rows_per_block, lanes), lambda i: (i, 0)),
        ),
        compiler_params=pltpu.CompilerParams(
            dimension_semantics=("parallel",),
            # 4 pipeline buffers (2 in + 2 out, <=8 MiB each) + compiler scratch;
            # fits v7x's 64 MiB VMEM, raises v5e's 16 MiB scoped default.
            vmem_limit_bytes=48 * 1024 * 1024,
        ),
        **kwargs,
    )(x2)


def gelu_pallas(
    x,
    *,
    target_block_bytes=8 * 1024 * 1024,
    min_pallas_bytes=1 << 20,
    donate_input=False,
):
    orig_shape = x.shape
    dtype = x.dtype
    n = int(x.size)
    if n == 0:
        return x

    itemsize = jnp.dtype(dtype).itemsize
    if n * itemsize < min_pallas_bytes:
        # Tiny activation: launch/pipeline overhead dominates; let XLA fuse it.
        return _gelu_jnp(x)

    flat = x.reshape(-1)

    # Lane-dense flatten: largest lane width C (multiple of 128, <= 8192)
    # that divides the element count -> unmasked full-lane stores, no padding.
    lanes = None
    for cand in (8192, 4096, 2048, 1024, 512, 256, 128):
        if n % cand == 0:
            lanes = cand
            break

    if lanes is not None:
        rows = n // lanes
        out2 = _gelu_pallas_2d(
            flat.reshape(rows, lanes), rows, lanes, dtype, target_block_bytes,
            donate_input,
        )
        return out2.reshape(orig_shape)

    # Ragged size: Pallas on the 128-aligned prefix, plain jnp on the
    # <=127-element tail (no whole-array pad/slice HBM round trips).
    lanes = 128
    n_main = (n // lanes) * lanes
    if n_main == 0:
        return _gelu_jnp(x)
    rows = n_main // lanes
    main_out = _gelu_pallas_2d(
        flat[:n_main].reshape(rows, lanes), rows, lanes, dtype, target_block_bytes,
        donate_input=False,
    ).reshape(-1)
    tail_out = _gelu_jnp(flat[n_main:])
    return jnp.concatenate([main_out, tail_out]).reshape(orig_shape)


def gelu_reference(x):
    xf = x.astype(jnp.float32)
    c = jnp.sqrt(jnp.float32(2.0) / jnp.pi)
    y = 0.5 * xf * (1.0 + jnp.tanh(c * (xf + 0.044715 * xf ** 3)))
    return y.astype(x.dtype)


if __name__ == "__main__":
    key = jax.random.PRNGKey(0)
    # Small transformer activation shape: (batch, seq, hidden).
    x = jax.random.normal(key, (2, 8, 32), dtype=jnp.float32)

    # Force the Pallas path (default cutoff would route tiny tensors to jnp).
    y = jax.block_until_ready(gelu_pallas(x, min_pallas_bytes=0))
    y_ref = gelu_reference(x)
    assert y.shape == x.shape and y.dtype == x.dtype
    assert jnp.allclose(y, y_ref, atol=1e-5, rtol=1e-5), "f32 mismatch vs reference"

    # bf16 inputs now use f32 internal compute -> tight tolerance.
    xb = x.astype(jnp.bfloat16)
    yb = jax.block_until_ready(gelu_pallas(xb, min_pallas_bytes=0))
    yb_ref = gelu_reference(xb)
    assert yb.shape == xb.shape and yb.dtype == xb.dtype
    assert jnp.allclose(
        yb.astype(jnp.float32), yb_ref.astype(jnp.float32), atol=1e-2, rtol=1e-2
    ), "bf16 mismatch vs reference"

    # Ragged element count (not a multiple of 128): prefix Pallas + jnp tail.
    xr = jax.random.normal(jax.random.PRNGKey(1), (2, 8, 33), dtype=jnp.float32)
    yr = jax.block_until_ready(gelu_pallas(xr, min_pallas_bytes=0))
    assert jnp.allclose(yr, gelu_reference(xr), atol=1e-5, rtol=1e-5), "ragged mismatch"

    # Default small-size cutoff path (pure jnp).
    ys = jax.block_until_ready(gelu_pallas(x))
    assert jnp.allclose(ys, y_ref, atol=1e-5, rtol=1e-5), "cutoff path mismatch"

    print("KERNEL_OK")
</pallas_src>

<mosaic_0001>
module attributes {stable_mosaic.version = 11 : i64} {
  func.func @_gelu_kernel(%arg0: i32, %arg1: memref<1x512xf32, #tpu.memory_space<vmem>>, %arg2: memref<1x512xf32, #tpu.memory_space<vmem>>) attributes {dimension_semantics = [#tpu.dimension_semantics<parallel>], iteration_bounds = array<i64: 1>, scalar_prefetch = 0 : i64, scratch_operands = 0 : i64, tpu.core_type = #tpu.core_type<tc>, window_params = [{transform_indices = @transform_0, window_bounds = array<i64: 1, 512>}, {transform_indices = @transform_1, window_bounds = array<i64: 1, 512>}]} {
    %c0 = arith.constant 0 : index
    %c0_0 = arith.constant 0 : index
    %0 = vector.load %arg1[%c0, %c0_0] : memref<1x512xf32, #tpu.memory_space<vmem>>, vector<1x512xf32>
    %cst = arith.constant 0.797884583 : f32
    %1 = vector.broadcast %cst : f32 to vector<1x512xf32>
    %2 = arith.mulf %1, %0 : vector<1x512xf32>
    %cst_1 = arith.constant 4.471500e-02 : f32
    %3 = vector.broadcast %cst_1 : f32 to vector<1x512xf32>
    %4 = arith.mulf %3, %0 : vector<1x512xf32>
    %5 = arith.mulf %4, %0 : vector<1x512xf32>
    %cst_2 = arith.constant 1.000000e+00 : f32
    %6 = vector.broadcast %cst_2 : f32 to vector<1x512xf32>
    %7 = arith.addf %6, %5 : vector<1x512xf32>
    %8 = arith.mulf %2, %7 : vector<1x512xf32>
    %cst_3 = arith.constant 5.000000e-01 : f32
    %9 = vector.broadcast %cst_3 : f32 to vector<1x512xf32>
    %10 = arith.mulf %9, %0 : vector<1x512xf32>
    %11 = math.tanh %8 : vector<1x512xf32>
    %cst_4 = arith.constant 1.000000e+00 : f32
    %12 = vector.broadcast %cst_4 : f32 to vector<1x512xf32>
    %13 = arith.addf %12, %11 : vector<1x512xf32>
    %14 = arith.mulf %10, %13 : vector<1x512xf32>
    %c0_5 = arith.constant 0 : index
    %c0_6 = arith.constant 0 : index
    %15 = vector.load %arg2[%c0_5, %c0_6] : memref<1x512xf32, #tpu.memory_space<vmem>>, vector<1x512xf32>
    tpu.vector_store %arg2[%c0_5, %c0_6], %14 {strides = array<i32>} : memref<1x512xf32, #tpu.memory_space<vmem>>, vector<1x512xf32>,
    return
  }
  func.func @transform_0(%arg0: i32) -> (i32, i32) {
    %c0_i32 = arith.constant 0 : i32
    %c0_i32_0 = arith.constant 0 : i32
    return %arg0, %c0_i32 : i32, i32
  }
  func.func @transform_1(%arg0: i32) -> (i32, i32) {
    %c0_i32 = arith.constant 0 : i32
    %c0_i32_0 = arith.constant 0 : i32
    return %arg0, %c0_i32 : i32, i32
  }
}

</mosaic_0001>

<bundles_post_ra>
// kernel: tpu_custom_call.1
= control target key start
LH: loop header
LB: loop body
LE: loop exit
PB: predicated region body
PF: predicated region fallthrough
CT: control target
= control target key end

     0   :  { %6 = vsyncpa [#allocation3], 0  ;;  %s117_s0 = inlined_call_operand.hbm [shape: f32[1,512], index: 0, kind: input, shape index: {}]   ;;  %s118_s1 = inlined_call_operand.hbm [shape: f32[1,512], index: 1, kind: output, shape index: {}]  }
   0x1   :  { %7 = vsyncpa [#allocation4], 0  ;;  %s99_s6 = smov [#allocation2]  }
   0x2   :  { %s14_s7 = sshll.u32 %s99_s6, 4  ;;  %s15_s7 = int_to_ptr.vmem [resolvable:$true] %s14_s7 }
   0x3   :  { %s63_s8 = scalar_lea.vmem %s15_s7, 64  ;;  %p68_p1 = scmp.lt.s32.totalorder %s15_s7, %s15_s7 }
   0x4   :  { %p64_p0 = scmp.ne.s32.totalorder %s15_s7, %s63_s8  ;;  %p69_p2 = scmp.lt.s32.totalorder %s63_s8, %s63_s8 }
   0x6   :  { %p70_p3 = por %p69_p2, %p68_p1 }
   0x8   :  { %p71_p4 = pnand %p70_p3, %p64_p0 }
   0xa   :  { %74 = shalt.err (!%p71_p4)
}
   0xb   :  { %17 = dma.hbm_to_vmem [thread:$0]  %s117_s0, 64, %s15_s7, [#allocation3]  }
   0xc   :  { %95 = dma.done.wait [#allocation3], 64  }
   0xd   :  { %96 = vsyncadd [#allocation3], 4294967232  ;;  %v21_v0 = vld [vmem:[#allocation2] sm:$0xf]  ;;  %v31_v6 = vlaneseq  ;;  %s100_s11 = smov [#allocation5]  }
   0xe   :  { %v23_v1 = vmul.f32 0.044715, %v21_v0  ;;  %v22_v2 = vmul.f32 0.7978846, %v21_v0  ;;  %v27_v7 = vmul.f32 0.5, %v21_v0  ;;  %s42_s12 = sshll.u32 %s100_s11, 4  ;;  %s43_s12 = int_to_ptr.vmem [resolvable:$true] %s42_s12 }
   0xf   :  { %vm33_vm0 = vcmp.lt.s32.totalorder %v31_v6, 512  ;;  %s75_s0 = scalar_lea.vmem %s43_s12, 64  ;;  %p80_p6 = scmp.lt.s32.totalorder %s43_s12, %s43_s12 }
  0x10   :  { %v24_v3 = vmul.f32 %v23_v1, %v21_v0  ;;  %p76_p5 = scmp.ne.s32.totalorder %s43_s12, %s75_s0  ;;  %p81_p7 = scmp.lt.s32.totalorder %s75_s0, %s75_s0 }
  0x12   :  { %v25_v4 = vadd.f32 1.0, %v24_v3  ;;  %p82_p8 = por %p81_p7, %p80_p6 }
  0x14   :  { %v26_v5 = vmul.f32 %v25_v4, %v22_v2  ;;  %p83_p9 = pnand %p82_p8, %p76_p5 }
  0x16   :  { %53 = vtanh.f32 %v26_v5 }
  0x23   :  { %v54_v8 = vpop.eup %53 }
  0x24   :  { %v29_v9 = vadd.f32 1.0, %v54_v8 }
  0x26   :  { %v30_v10 = vmul.f32 %v29_v9, %v27_v7 }
  0x28   :  { %35 = vst.msk [vmem:[#allocation5] sm:$0xf] %vm33_vm0, %v30_v10 }
  0x29   :  { %86 = shalt.err (!%p83_p9)
}
  0x2a   :  { %45 = dma.vmem_to_hbm [thread:$0]  %s43_s12, 64, %s118_s1, [#allocation4]  }
  0x2b   :  { %97 = dma.done.wait [#allocation4], 64  }
  0x2c   :  { %98 = vsyncadd [#allocation4], 4294967232 }
  0x2d   :  { %49 = vsyncpa [#allocation3], 1 }
  0x2e   :  { %50 = vsyncpa [#allocation4], 1 }

</bundles_post_ra>
